<compile_context>
chip_gen: v7x
topology: tpu7x:2x2x1
jax: 0.10.0
libtpu: 0.0.40
codegen_flags: <defaults>
</compile_context>

<pallas_src>
import functools

import jax
import jax.numpy as jnp
from jax.experimental import pallas as pl
from jax.experimental.pallas import tpu as pltpu

LANE = 128        # TPU lane width (last dim)
TB_GRAN = 16      # batch-tile granularity: lcm(f32 sublane 8, bf16 sublane 16)


def _round_up(x, m):
    return (x + m - 1) // m * m


def _tpu_generation():
    try:
        kind = jax.devices()[0].device_kind.lower()
    except Exception:
        return 6
    for g in (7, 6, 5, 4):
        if f"v{g}" in kind:
            return g
    return 6


_GEN = _tpu_generation()
# MXU geometry: 128x128 on v5e and earlier, 256x256 on v6e/v7x -> pad hidden/class lanes
# to the MXU width so each matmul fills the systolic array.
_MXU = 256 if _GEN >= 6 else 128
# Largest batch tile: v5e/v6e (128 MiB VMEM, lower HBM BW) amortize per-step overhead with
# 1024-row tiles; v7x (64 MiB VMEM, 2 TCs) keeps 512 so the batch axis still splits.
_MAX_TB = 512 if _GEN >= 7 else 1024
# VMEM ceilings with headroom below the physical limit (64 MiB v7x, 128 MiB v5e/v6e).
_VMEM_CAP = (48 << 20) if _GEN >= 7 else (96 << 20)


def mlp_kernel(x_ref, w1_ref, b1_ref, w2_ref, b2_ref, w3_ref, b3_ref, o_ref):
    # One fused 3-layer MLP per batch tile. Weights arrive pre-transposed (in, out) and
    # lane-padded; biases are (1, out) f32 rows. All matmuls accumulate in f32 on the MXU;
    # bias add / ReLU run in f32 on the VPU.

    # Layer 1 in f32 (K = input_size is small; keeps logits close to the f32 reference).
    h1 = jnp.dot(x_ref[...], w1_ref[...], preferred_element_type=jnp.float32)
    h1 = jnp.maximum(h1 + b1_ref[...], 0.0)                    # (TB, HP) + (1, HP)

    # Layers 2/3: bf16 MXU inputs, f32 accumulation.
    h2 = jnp.dot(h1.astype(jnp.bfloat16), w2_ref[...],
                 preferred_element_type=jnp.float32)
    h2 = jnp.maximum(h2 + b2_ref[...], 0.0)

    out = jnp.dot(h2.astype(jnp.bfloat16), w3_ref[...],
                  preferred_element_type=jnp.float32)
    o_ref[...] = (out + b3_ref[...]).astype(o_ref.dtype)       # bf16 writeback


def prepare_params(params):
    """One-time packing (NOT per-call): transpose PyTorch (out,in) weights to (in,out),
    zero-pad feature dims up to the MXU width, cast layer-2/3 weights to bf16 (layer-1
    weight stays f32), biases to (1, out) f32 rows."""
    w1, b1 = params["w1"], params["b1"]   # (H, I), (H,)
    w2, b2 = params["w2"], params["b2"]   # (H, H), (H,)
    w3, b3 = params["w3"], params["b3"]   # (C, H), (C,)
    H, I = w1.shape
    C = w3.shape[0]
    HP = _round_up(H, _MXU)
    CP = _round_up(C, _MXU)

    def pad2(a, shape, dtype):
        return jnp.zeros(shape, dtype).at[: a.shape[0], : a.shape[1]].set(a.astype(dtype))

    return {
        "w1": pad2(w1.T, (I, HP), jnp.float32),
        "b1": jnp.zeros((1, HP), jnp.float32).at[0, :H].set(b1),
        "w2": pad2(w2.T, (HP, HP), jnp.bfloat16),
        "b2": jnp.zeros((1, HP), jnp.float32).at[0, :H].set(b2),
        "w3": pad2(w3.T, (HP, CP), jnp.bfloat16),
        "b3": jnp.zeros((1, CP), jnp.float32).at[0, :C].set(b3),
    }


@functools.partial(jax.jit, static_argnames=("num_classes",))
def neural_net_forward(x, packed, num_classes):
    """x: (B, input_size) f32.  packed: output of prepare_params (called once)."""
    B, I = x.shape
    HP = packed["w2"].shape[0]
    CP = packed["w3"].shape[1]

    # Batch tiling: split B evenly into <= _MAX_TB-row tiles (avoids the old
    # round_up(B, 512) ~2x padding blow-up); round each tile to TB_GRAN rows.
    n_tiles = max(1, -(-B // _MAX_TB))
    if _GEN >= 7 and B >= 1024 and n_tiles < 2:
        n_tiles = 2                               # keep both v7x TensorCores busy
    TB = _round_up(-(-B // n_tiles), TB_GRAN)
    BP = TB * n_tiles
    if BP != B:
        x = jnp.pad(x, ((0, BP - B), (0, 0)))
    grid = (n_tiles,)

    # Resident weights (single-buffered) + double-buffered x/out streams + f32 intermediates.
    weight_bytes = I * HP * 4 + HP * HP * 2 + HP * CP * 2 + (2 * HP + CP) * 4
    stream_bytes = 2 * TB * I * 4 + 2 * TB * CP * 2
    interm_bytes = 2 * TB * HP * 4
    vmem_budget = int(1.25 * (weight_bytes + stream_bytes + interm_bytes)) + (4 << 20)
    vmem_budget = min(max(vmem_budget, 16 << 20), _VMEM_CAP)

    flops = 2 * BP * (I * HP + HP * HP + HP * CP)
    bytes_accessed = (
        BP * I * 4                                    # x (f32)
        + I * HP * 4 + (HP * HP + HP * CP) * 2        # weights (f32 / bf16)
        + (2 * HP + CP) * 4                           # biases
        + BP * CP * 2                                 # bf16 output
    )

    resident = pl.Buffered(1)   # constant index_map -> no second VMEM copy of the weights

    out = pl.pallas_call(
        mlp_kernel,
        out_shape=jax.ShapeDtypeStruct((BP, CP), jnp.bfloat16),
        grid=grid,
        in_specs=[
            pl.BlockSpec((TB, I), lambda i: (i, 0)),   # x tile marches over batch
            pl.BlockSpec((I, HP), lambda i: (0, 0), pipeline_mode=resident),
            pl.BlockSpec((1, HP), lambda i: (0, 0), pipeline_mode=resident),
            pl.BlockSpec((HP, HP), lambda i: (0, 0), pipeline_mode=resident),
            pl.BlockSpec((1, HP), lambda i: (0, 0), pipeline_mode=resident),
            pl.BlockSpec((HP, CP), lambda i: (0, 0), pipeline_mode=resident),
            pl.BlockSpec((1, CP), lambda i: (0, 0), pipeline_mode=resident),
        ],
        out_specs=pl.BlockSpec((TB, CP), lambda i: (i, 0)),
        compiler_params=pltpu.CompilerParams(
            dimension_semantics=("parallel",),          # megacore-shardable batch axis
            vmem_limit_bytes=vmem_budget,
        ),
        cost_estimate=pl.CostEstimate(
            flops=flops, transcendentals=0, bytes_accessed=bytes_accessed),
    )(x, packed["w1"], packed["b1"], packed["w2"], packed["b2"],
      packed["w3"], packed["b3"])

    # Slice padded batch / lane-padded logits back and cast to f32 for the caller.
    return out[:B, :num_classes].astype(jnp.float32)


def init_params(key, input_size, hidden_size, num_classes):
    """Deterministic init matching the nn.Linear shapes in __init__ (PyTorch layout)."""
    k1, k2, k3, k4, k5, k6 = jax.random.split(key, 6)
    s1 = 1.0 / jnp.sqrt(input_size)
    s2 = 1.0 / jnp.sqrt(hidden_size)
    return {
        "w1": jax.random.uniform(k1, (hidden_size, input_size), jnp.float32, -s1, s1),
        "b1": jax.random.uniform(k2, (hidden_size,), jnp.float32, -s1, s1),
        "w2": jax.random.uniform(k3, (hidden_size, hidden_size), jnp.float32, -s2, s2),
        "b2": jax.random.uniform(k4, (hidden_size,), jnp.float32, -s2, s2),
        "w3": jax.random.uniform(k5, (num_classes, hidden_size), jnp.float32, -s2, s2),
        "b3": jax.random.uniform(k6, (num_classes,), jnp.float32, -s2, s2),
    }


if __name__ == "__main__":
    # Small shapes consistent with the module: batch=8, input=64, hidden=32, classes=10.
    B, INPUT, HIDDEN, CLASSES = 8, 64, 32, 10

    key = jax.random.PRNGKey(0)
    kx, kp = jax.random.split(key)
    x = jax.random.normal(kx, (B, INPUT), dtype=jnp.float32)
    params = init_params(kp, INPUT, HIDDEN, CLASSES)

    # One-time parameter packing (transpose + pad + cast happen here, not per call).
    packed = prepare_params(params)

    out = neural_net_forward(x, packed, CLASSES)
    out = jax.block_until_ready(out)

    # Pure-JAX f32 reference of the same forward pass. Tolerance accounts for bf16
    # matmul inputs (layers 2/3) and the bf16 output writeback.
    h1 = jnp.maximum(x @ params["w1"].T + params["b1"], 0.0)
    h2 = jnp.maximum(h1 @ params["w2"].T + params["b2"], 0.0)
    ref = h2 @ params["w3"].T + params["b3"]
    assert out.shape == (B, CLASSES)
    assert jnp.allclose(out, ref, atol=5e-2, rtol=5e-2), "mismatch vs reference"

    print("KERNEL_OK")
</pallas_src>

<mosaic_0001>
module attributes {stable_mosaic.version = 11 : i64} {
  func.func @mlp_kernel(%arg0: i32, %arg1: memref<16x64xf32, #tpu.memory_space<vmem>>, %arg2: memref<64x256xf32, #tpu.memory_space<vmem>>, %arg3: memref<1x256xf32, #tpu.memory_space<vmem>>, %arg4: memref<256x256xbf16, #tpu.memory_space<vmem>>, %arg5: memref<1x256xf32, #tpu.memory_space<vmem>>, %arg6: memref<256x256xbf16, #tpu.memory_space<vmem>>, %arg7: memref<1x256xf32, #tpu.memory_space<vmem>>, %arg8: memref<16x256xbf16, #tpu.memory_space<vmem>>) attributes {dimension_semantics = [#tpu.dimension_semantics<parallel>], iteration_bounds = array<i64: 1>, scalar_prefetch = 0 : i64, scratch_operands = 0 : i64, tpu.core_type = #tpu.core_type<tc>, window_params = [{transform_indices = @transform_0, window_bounds = array<i64: 16, 64>}, {pipeline_mode = #tpu.pipeline_mode<synchronous>, transform_indices = @transform_1, window_bounds = array<i64: 64, 256>}, {pipeline_mode = #tpu.pipeline_mode<synchronous>, transform_indices = @transform_2, window_bounds = array<i64: 1, 256>}, {pipeline_mode = #tpu.pipeline_mode<synchronous>, transform_indices = @transform_3, window_bounds = array<i64: 256, 256>}, {pipeline_mode = #tpu.pipeline_mode<synchronous>, transform_indices = @transform_4, window_bounds = array<i64: 1, 256>}, {pipeline_mode = #tpu.pipeline_mode<synchronous>, transform_indices = @transform_5, window_bounds = array<i64: 256, 256>}, {pipeline_mode = #tpu.pipeline_mode<synchronous>, transform_indices = @transform_6, window_bounds = array<i64: 1, 256>}, {transform_indices = @transform_7, window_bounds = array<i64: 16, 256>}]} {
    %c0 = arith.constant 0 : index
    %c0_0 = arith.constant 0 : index
    %0 = vector.load %arg1[%c0, %c0_0] : memref<16x64xf32, #tpu.memory_space<vmem>>, vector<16x64xf32>
    %c0_1 = arith.constant 0 : index
    %c0_2 = arith.constant 0 : index
    %1 = vector.load %arg2[%c0_1, %c0_2] : memref<64x256xf32, #tpu.memory_space<vmem>>, vector<64x256xf32>
    %cst = arith.constant dense<0.000000e+00> : vector<16x256xf32>
    %2 = tpu.matmul %0, %1, %cst {dimension_numbers = #tpu.dot_dimension_numbers<[1], [0], [0], [1], [0, 0, 1, 1], [], []>} : vector<16x64xf32>, vector<64x256xf32>, vector<16x256xf32> -> vector<16x256xf32>
    %c0_3 = arith.constant 0 : index
    %c0_4 = arith.constant 0 : index
    %3 = vector.load %arg3[%c0_3, %c0_4] : memref<1x256xf32, #tpu.memory_space<vmem>>, vector<1x256xf32>
    %4 = vector.broadcast %3 : vector<1x256xf32> to vector<16x256xf32>
    %5 = arith.addf %2, %4 : vector<16x256xf32>
    %cst_5 = arith.constant 0.000000e+00 : f32
    %6 = vector.broadcast %cst_5 : f32 to vector<16x256xf32>
    %7 = arith.maximumf %5, %6 : vector<16x256xf32>
    %8 = arith.truncf %7 : vector<16x256xf32> to vector<16x256xbf16>
    %c0_6 = arith.constant 0 : index
    %c0_7 = arith.constant 0 : index
    %9 = vector.load %arg4[%c0_6, %c0_7] : memref<256x256xbf16, #tpu.memory_space<vmem>>, vector<256x256xbf16>
    %cst_8 = arith.constant dense<0.000000e+00> : vector<16x256xf32>
    %10 = tpu.matmul %8, %9, %cst_8 {dimension_numbers = #tpu.dot_dimension_numbers<[1], [0], [0], [1], [0, 0, 1, 1], [], []>} : vector<16x256xbf16>, vector<256x256xbf16>, vector<16x256xf32> -> vector<16x256xf32>
    %c0_9 = arith.constant 0 : index
    %c0_10 = arith.constant 0 : index
    %11 = vector.load %arg5[%c0_9, %c0_10] : memref<1x256xf32, #tpu.memory_space<vmem>>, vector<1x256xf32>
    %12 = vector.broadcast %11 : vector<1x256xf32> to vector<16x256xf32>
    %13 = arith.addf %10, %12 : vector<16x256xf32>
    %cst_11 = arith.constant 0.000000e+00 : f32
    %14 = vector.broadcast %cst_11 : f32 to vector<16x256xf32>
    %15 = arith.maximumf %13, %14 : vector<16x256xf32>
    %16 = arith.truncf %15 : vector<16x256xf32> to vector<16x256xbf16>
    %c0_12 = arith.constant 0 : index
    %c0_13 = arith.constant 0 : index
    %17 = vector.load %arg6[%c0_12, %c0_13] : memref<256x256xbf16, #tpu.memory_space<vmem>>, vector<256x256xbf16>
    %cst_14 = arith.constant dense<0.000000e+00> : vector<16x256xf32>
    %18 = tpu.matmul %16, %17, %cst_14 {dimension_numbers = #tpu.dot_dimension_numbers<[1], [0], [0], [1], [0, 0, 1, 1], [], []>} : vector<16x256xbf16>, vector<256x256xbf16>, vector<16x256xf32> -> vector<16x256xf32>
    %c0_15 = arith.constant 0 : index
    %c0_16 = arith.constant 0 : index
    %19 = vector.load %arg7[%c0_15, %c0_16] : memref<1x256xf32, #tpu.memory_space<vmem>>, vector<1x256xf32>
    %20 = vector.broadcast %19 : vector<1x256xf32> to vector<16x256xf32>
    %21 = arith.addf %18, %20 : vector<16x256xf32>
    %22 = arith.truncf %21 : vector<16x256xf32> to vector<16x256xbf16>
    %c0_17 = arith.constant 0 : index
    %c0_18 = arith.constant 0 : index
    %23 = vector.load %arg8[%c0_17, %c0_18] : memref<16x256xbf16, #tpu.memory_space<vmem>>, vector<16x256xbf16>
    tpu.vector_store %arg8[%c0_17, %c0_18], %22 {strides = array<i32>} : memref<16x256xbf16, #tpu.memory_space<vmem>>, vector<16x256xbf16>,
    return
  }
  func.func @transform_0(%arg0: i32) -> (i32, i32) {
    %c0_i32 = arith.constant 0 : i32
    %c0_i32_0 = arith.constant 0 : i32
    return %arg0, %c0_i32 : i32, i32
  }
  func.func @transform_1(%arg0: i32) -> (i32, i32) {
    %c0_i32 = arith.constant 0 : i32
    %c0_i32_0 = arith.constant 0 : i32
    %c0_i32_1 = arith.constant 0 : i32
    return %c0_i32, %c0_i32_0 : i32, i32
  }
  func.func @transform_2(%arg0: i32) -> (i32, i32) {
    %c0_i32 = arith.constant 0 : i32
    %c0_i32_0 = arith.constant 0 : i32
    %c0_i32_1 = arith.constant 0 : i32
    return %c0_i32, %c0_i32_0 : i32, i32
  }
  func.func @transform_3(%arg0: i32) -> (i32, i32) {
    %c0_i32 = arith.constant 0 : i32
    %c0_i32_0 = arith.constant 0 : i32
    %c0_i32_1 = arith.constant 0 : i32
    return %c0_i32, %c0_i32_0 : i32, i32
  }
  func.func @transform_4(%arg0: i32) -> (i32, i32) {
    %c0_i32 = arith.constant 0 : i32
    %c0_i32_0 = arith.constant 0 : i32
    %c0_i32_1 = arith.constant 0 : i32
    return %c0_i32, %c0_i32_0 : i32, i32
  }
  func.func @transform_5(%arg0: i32) -> (i32, i32) {
    %c0_i32 = arith.constant 0 : i32
    %c0_i32_0 = arith.constant 0 : i32
    %c0_i32_1 = arith.constant 0 : i32
    return %c0_i32, %c0_i32_0 : i32, i32
  }
  func.func @transform_6(%arg0: i32) -> (i32, i32) {
    %c0_i32 = arith.constant 0 : i32
    %c0_i32_0 = arith.constant 0 : i32
    %c0_i32_1 = arith.constant 0 : i32
    return %c0_i32, %c0_i32_0 : i32, i32
  }
  func.func @transform_7(%arg0: i32) -> (i32, i32) {
    %c0_i32 = arith.constant 0 : i32
    %c0_i32_0 = arith.constant 0 : i32
    return %arg0, %c0_i32 : i32, i32
  }
}

</mosaic_0001>

<bundles_post_ra>
// kernel: neural_net_forward.1
= control target key start
LH: loop header
LB: loop body
LE: loop exit
PB: predicated region body
PF: predicated region fallthrough
CT: control target
= control target key end

     0   :  { %12 = vsyncpa [#allocation3], 0  ;;  %s1078_s0 = inlined_call_operand.vmem [shape: f32[16,64], index: 0, kind: input, shape index: {}]   ;;  %s1079_s1 = inlined_call_operand.hbm [shape: f32[64,256], index: 1, kind: input, shape index: {}]   ;;  %s1080_s2 = inlined_call_operand.vmem [shape: f32[1,256], index: 2, kind: input, shape index: {}]   ;;  %s1081_s3 = inlined_call_operand.hbm [shape: bf16[256,256], index: 3, kind: input, shape index: {}]   ;;  %s1082_s4 = inlined_call_operand.vmem [shape: f32[1,256], index: 4, kind: input, shape index: {}]   ;;  %s1083_s5 = inlined_call_operand.hbm [shape: bf16[256,256], index: 5, kind: input, shape index: {}]   ;;  %s1084_s6 = inlined_call_operand.vmem [shape: f32[1,256], index: 6, kind: input, shape index: {}]   ;;  %s1085_s7 = inlined_call_operand.vmem [shape: bf16[16,256], index: 7, kind: output, shape index: {}]  }
   0x1   :  { %13 = vsyncpa [#allocation5], 0  ;;  %s967_s24 = smov [#allocation4]   ;;  %s897_s28 = scalar_lea.hbm %s1081_s3, 4096 }
   0x2   :  { %s35_s25 = sshll.u32 %s967_s24, 4  ;;  %p898_p0 = scmp.ne.s32.totalorder %s1081_s3, %s897_s28  ;;  %s36_s25 = int_to_ptr.vmem [resolvable:$true] %s35_s25 }
   0x3   :  { %p901_p1 = scmp.lt.u32.totalorder %s897_s28, %s1081_s3 }
   0x5   :  { %p903_p2 = pnand %p901_p1, %p898_p0 }
   0x7   :  { %906 = shalt.err (!%p903_p2)
}
   0x8   :  { %s907_s10 = scalar_lea.vmem %s36_s25, 4096  ;;  %p912_p4 = scmp.lt.s32.totalorder %s36_s25, %s36_s25 }
   0x9   :  { %p908_p3 = scmp.ne.s32.totalorder %s36_s25, %s907_s10  ;;  %p913_p5 = scmp.lt.s32.totalorder %s907_s10, %s907_s10 }
   0xb   :  { %p914_p6 = por %p913_p5, %p912_p4 }
   0xd   :  { %p915_p7 = pnand %p914_p6, %p908_p3 }
   0xf   :  { %918 = shalt.err (!%p915_p7)
}
  0x10   :  { %s968_s11 = smov 128   ;;  %s969_s12 = smov 8  }
  0x11   :  { %41 = dma.hbm_to_vmem [thread:$0]  %s1081_s3, 4096, %s36_s25, [#allocation5], %s968_s11, %s968_s11, %s969_s12  }
  0x12   :  { %s970_s15 = smov [#allocation2]   ;;  %s919_s19 = scalar_lea.hbm %s1079_s1, 2048 }
  0x13   :  { %s21_s16 = sshll.u32 %s970_s15, 4  ;;  %p920_p8 = scmp.ne.s32.totalorder %s1079_s1, %s919_s19  ;;  %s22_s16 = int_to_ptr.vmem [resolvable:$true] %s21_s16 }
  0x14   :  { %p923_p9 = scmp.lt.u32.totalorder %s919_s19, %s1079_s1 }
  0x16   :  { %p925_p10 = pnand %p923_p9, %p920_p8 }
  0x18   :  { %928 = shalt.err (!%p925_p10)
}
  0x19   :  { %s929_s24 = scalar_lea.vmem %s22_s16, 2048  ;;  %p934_p12 = scmp.lt.s32.totalorder %s22_s16, %s22_s16 }
  0x1a   :  { %p930_p11 = scmp.ne.s32.totalorder %s22_s16, %s929_s24  ;;  %p935_p13 = scmp.lt.s32.totalorder %s929_s24, %s929_s24 }
  0x1c   :  { %p936_p0 = por %p935_p13, %p934_p12 }
  0x1e   :  { %p937_p1 = pnand %p936_p0, %p930_p11 }
  0x20   :  { %940 = shalt.err (!%p937_p1)
}
  0x21   :  { %s971_s3 = smov 256   ;;  %s972_s25 = smov 16  }
  0x22   :  { %27 = dma.hbm_to_vmem [thread:$0]  %s1079_s1, 2048, %s22_s16, [#allocation3], %s971_s3, %s971_s3, %s972_s25  }
  0x23   :  { %s973_s28 = smov [#allocation6]   ;;  %s941_s9 = scalar_lea.hbm %s1083_s5, 4096 }
  0x24   :  { %s49_s29 = sshll.u32 %s973_s28, 4  ;;  %p942_p2 = scmp.ne.s32.totalorder %s1083_s5, %s941_s9  ;;  %s50_s29 = int_to_ptr.vmem [resolvable:$true] %s49_s29 }
  0x25   :  { %p945_p3 = scmp.lt.u32.totalorder %s941_s9, %s1083_s5 }
  0x27   :  { %p947_p4 = pnand %p945_p3, %p942_p2 }
  0x29   :  { %950 = shalt.err (!%p947_p4)
}
  0x2a   :  { %s951_s17 = scalar_lea.vmem %s50_s29, 4096  ;;  %p956_p6 = scmp.lt.s32.totalorder %s50_s29, %s50_s29 }
  0x2b   :  { %p952_p5 = scmp.ne.s32.totalorder %s50_s29, %s951_s17  ;;  %p957_p7 = scmp.lt.s32.totalorder %s951_s17, %s951_s17 }
  0x2d   :  { %p958_p8 = por %p957_p7, %p956_p6 }
  0x2f   :  { %p959_p9 = pnand %p958_p8, %p952_p5 }
  0x31   :  { %962 = shalt.err (!%p959_p9)
}
  0x32   :  { %55 = dma.hbm_to_vmem [thread:$0]  %s1083_s5, 4096, %s50_s29, [#allocation5], %s968_s11, %s968_s11, %s969_s12  }
  0x33   :  { %963 = dma.done.wait [#allocation3], 2048  }
  0x34   :  { %964 = vsyncadd [#allocation3], 4294965248 }
  0x35   :  { %965 = dma.done.wait [#allocation5], 8192  }
  0x36   :  { %966 = vsyncadd [#allocation5], 4294959104  ;;  %v974_v0 = vmov 0.0   ;;  %v70_v1 = vld [vmem:[#allocation2 + $0x8] sm:$0xff]  ;;  %v72_v2 = vld [vmem:[#allocation2 + $0x18] sm:$0xff]  ;;  %vm97_vm0 = vcmask 523264  }
  0x37   :  { %168 = vmatprep.mubr.f32.mxu0 %v974_v0  ;;  %v69_v3 = vld [vmem:[#allocation2] sm:$0xff]  ;;  %v777_v4 = vpack.c.bf16 %v72_v2, %v70_v1  ;;  %v71_v5 = vld [vmem:[#allocation2 + $0x10] sm:$0xff]  ;;  %v74_v6 = vld [vmem:[#allocation2 + $0x28] sm:$0xff] }
  0x38   :  { %v76_v7 = vld [vmem:[#allocation2 + $0x38] sm:$0xff]  ;;  %v779_v8 = vpack.c.bf16 %v71_v5, %v69_v3  ;;  %v73_v10 = vld [vmem:[#allocation2 + $0x20] sm:$0xff]  ;;  %v75_v11 = vld [vmem:[#allocation2 + $0x30] sm:$0xff] }
  0x39   :  { %v781_v9 = vpack.c.bf16 %v76_v7, %v74_v6  ;;  %v78_v12 = vld [vmem:[#allocation2 + $0x48] sm:$0xff]  ;;  %778 = vmatprep.subr.bf16.mxu0 %v777_v4  ;;  %v80_v13 = vld [vmem:[#allocation2 + $0x58] sm:$0xff]  ;;  %v783_v14 = vpack.c.bf16 %v75_v11, %v73_v10  ;;  %v77_v15 = vld [vmem:[#allocation2 + $0x40] sm:$0xff] }
  0x3a   :  { %780 = vmatpush1.bf16.msra.mxu0 %v779_v8  ;;  %v785_v16 = vpack.c.bf16 %v80_v13, %v78_v12  ;;  %v79_v17 = vld [vmem:[#allocation2 + $0x50] sm:$0xff]  ;;  %v82_v18 = vld [vmem:[#allocation2 + $0x68] sm:$0xff]  ;;  %v84_v19 = vld [vmem:[#allocation2 + $0x78] sm:$0xff] }
  0x3b   :  { %782 = vmatprep.subr.bf16.mxu0 %v781_v9  ;;  %v801_v20 = vld [vmem:[#allocation4 + $0x4] ss:$8 sps:$4 sm:$0xff]   ;;  %v803_v21 = vld [vmem:[#allocation4] ss:$8 sps:$4 sm:$0xff]   ;;  %v787_v22 = vpack.c.bf16 %v79_v17, %v77_v15  ;;  %v804_v24 = vld [vmem:[#allocation4 + $0x14] ss:$8 sps:$4 sm:$0xff]   ;;  %v789_v25 = vpack.c.bf16 %v84_v19, %v82_v18 }
  0x3c   :  { %v81_v23 = vld [vmem:[#allocation2 + $0x60] sm:$0xff]  ;;  %391 = vmatprep.subr.bf16.mxu1 %v801_v20  ;;  %v83_v26 = vld [vmem:[#allocation2 + $0x70] sm:$0xff]  ;;  %v68_v35 = vld [vmem:[%s1078_s0 + $0x8] sm:$0xff] }
  0x3d   :  { %392 = vmatpush1.bf16.msra.mxu1 %v803_v21  ;;  %v806_v27 = vld [vmem:[#allocation4 + $0x10] ss:$8 sps:$4 sm:$0xff]   ;;  %v807_v28 = vld [vmem:[#allocation4 + $0x24] ss:$8 sps:$4 sm:$0xff]   ;;  %v791_v29 = vpack.c.bf16 %v83_v26, %v81_v23  ;;  %v809_v30 = vld [vmem:[#allocation4 + $0x20] ss:$8 sps:$4 sm:$0xff]   ;;  %v87_v23 = vlaneseq }
  0x3e   :  { %784 = vmatpush1.bf16.msra.mxu0 %v783_v14  ;;  %393 = vmatprep.subr.bf16.mxu1 %v804_v24  ;;  %v810_v31 = vld [vmem:[#allocation4 + $0x34] ss:$8 sps:$4 sm:$0xff]   ;;  %v67_v32 = vld [vmem:[%s1078_s0] sm:$0xff]  ;;  %v812_v33 = vld [vmem:[#allocation4 + $0x30] ss:$8 sps:$4 sm:$0xff]  }
  0x3f   :  { %786 = vmatprep.subr.bf16.mxu0 %v785_v16  ;;  %v813_v34 = vld [vmem:[#allocation4 + $0x44] ss:$8 sps:$4 sm:$0xff]   ;;  %v815_v36 = vld [vmem:[#allocation4 + $0x40] ss:$8 sps:$4 sm:$0xff]   ;;  %v816_v37 = vld [vmem:[#allocation4 + $0x54] ss:$8 sps:$4 sm:$0xff]  }
  0x40   :  { %v818_v38 = vld [vmem:[#allocation4 + $0x50] ss:$8 sps:$4 sm:$0xff]   ;;  %v819_v39 = vld [vmem:[#allocation4 + $0x64] ss:$8 sps:$4 sm:$0xff]   ;;  %v821_v40 = vld [vmem:[#allocation4 + $0x60] ss:$8 sps:$4 sm:$0xff]  }
  0x41   :  { %394 = vmatpush1.bf16.msra.mxu1 %v806_v27  ;;  %v822_v41 = vld [vmem:[#allocation4 + $0x74] ss:$8 sps:$4 sm:$0xff]   ;;  %v824_v42 = vld [vmem:[#allocation4 + $0x70] ss:$8 sps:$4 sm:$0xff]   ;;  %v825_v43 = vld [vmem:[#allocation4 + $0x84] ss:$8 sps:$4 sm:$0xff]  }
  0x42   :  { %788 = vmatpush1.bf16.msra.mxu0 %v787_v22  ;;  %395 = vmatprep.subr.bf16.mxu1 %v807_v28  ;;  %v827_v44 = vld [vmem:[#allocation4 + $0x80] ss:$8 sps:$4 sm:$0xff]   ;;  %v828_v45 = vld [vmem:[#allocation4 + $0x94] ss:$8 sps:$4 sm:$0xff]   ;;  %v830_v46 = vld [vmem:[#allocation4 + $0x90] ss:$8 sps:$4 sm:$0xff]  }
  0x43   :  { %790 = vmatprep.subr.bf16.mxu0 %v789_v25  ;;  %v831_v47 = vld [vmem:[#allocation4 + $0xa4] ss:$8 sps:$4 sm:$0xff]   ;;  %v833_v48 = vld [vmem:[#allocation4 + $0xa0] ss:$8 sps:$4 sm:$0xff]   ;;  %v834_v49 = vld [vmem:[#allocation4 + $0xb4] ss:$8 sps:$4 sm:$0xff]  }
  0x44   :  { %v836_v50 = vld [vmem:[#allocation4 + $0xb0] ss:$8 sps:$4 sm:$0xff]   ;;  %v837_v51 = vld [vmem:[#allocation4 + $0xc4] ss:$8 sps:$4 sm:$0xff]   ;;  %v839_v52 = vld [vmem:[#allocation4 + $0xc0] ss:$8 sps:$4 sm:$0xff]  }
  0x45   :  { %396 = vmatpush1.bf16.msra.mxu1 %v809_v30  ;;  %v840_v53 = vld [vmem:[#allocation4 + $0xd4] ss:$8 sps:$4 sm:$0xff]   ;;  %v842_v54 = vld [vmem:[#allocation4 + $0xd0] ss:$8 sps:$4 sm:$0xff]   ;;  %v843_v55 = vld [vmem:[#allocation4 + $0xe4] ss:$8 sps:$4 sm:$0xff]  }
  0x46   :  { %792 = vmatpush1.bf16.msra.mxu0 %v791_v29  ;;  %397 = vmatprep.subr.bf16.mxu1 %v810_v31  ;;  %v845_v56 = vld [vmem:[#allocation4 + $0xe0] ss:$8 sps:$4 sm:$0xff]   ;;  %v846_v57 = vld [vmem:[#allocation4 + $0xf4] ss:$8 sps:$4 sm:$0xff]   ;;  %v848_v58 = vld [vmem:[#allocation4 + $0xf0] ss:$8 sps:$4 sm:$0xff]  }
  0x47   :  { %v849_v59 = vld [vmem:[#allocation6] ss:$8 sps:$4 sm:$0xff]   ;;  %v851_v60 = vld [vmem:[#allocation6 + $0x4] ss:$8 sps:$4 sm:$0xff]   ;;  %v854_v61 = vld [vmem:[#allocation6 + $0x14] ss:$8 sps:$4 sm:$0xff]  }
  0x48   :  { %644 = vmatprep.subr.bf16.mxu0 %v851_v60  ;;  %v852_v62 = vld [vmem:[#allocation6 + $0x10] ss:$8 sps:$4 sm:$0xff]   ;;  %v857_v63 = vld [vmem:[#allocation6 + $0x24] ss:$8 sps:$4 sm:$0xff]   ;;  %v860_v1 = vld [vmem:[#allocation6 + $0x34] ss:$8 sps:$4 sm:$0xff]  }
  0x49   :  { %707 = vmatmul.mubr.msk.f32.vlgmr.msra.gmra.mrb[0].mxu0 %vm97_vm0, %v67_v32  ;;  %398 = vmatpush1.bf16.msra.mxu1 %v812_v33  ;;  %v858_v2 = vld [vmem:[#allocation6 + $0x30] ss:$8 sps:$4 sm:$0xff]   ;;  %v863_v3 = vld [vmem:[#allocation6 + $0x44] ss:$8 sps:$4 sm:$0xff]   ;;  %v861_v4 = vld [vmem:[#allocation6 + $0x40] ss:$8 sps:$4 sm:$0xff]  }
  0x4a   :  { %174 = vmatprep.mubr.f32.mxu0 %v974_v0  ;;  %399 = vmatprep.subr.bf16.mxu1 %v813_v34  ;;  %v855_v0 = vld [vmem:[#allocation6 + $0x20] ss:$8 sps:$4 sm:$0xff]   ;;  %v866_v5 = vld [vmem:[#allocation6 + $0x54] ss:$8 sps:$4 sm:$0xff]   ;;  %v864_v6 = vld [vmem:[#allocation6 + $0x50] ss:$8 sps:$4 sm:$0xff]  }
  0x4b   :  { %645 = vmatpush1.bf16.msra.mxu0 %v849_v59  ;;  %v869_v7 = vld [vmem:[#allocation6 + $0x64] ss:$8 sps:$4 sm:$0xff]   ;;  %v867_v8 = vld [vmem:[#allocation6 + $0x60] ss:$8 sps:$4 sm:$0xff]   ;;  %v872_v9 = vld [vmem:[#allocation6 + $0x74] ss:$8 sps:$4 sm:$0xff]  }
  0x4c   :  { %646 = vmatprep.subr.bf16.mxu0 %v854_v61  ;;  %v870_v10 = vld [vmem:[#allocation6 + $0x70] ss:$8 sps:$4 sm:$0xff]   ;;  %v875_v11 = vld [vmem:[#allocation6 + $0x84] ss:$8 sps:$4 sm:$0xff]   ;;  %v873_v12 = vld [vmem:[#allocation6 + $0x80] ss:$8 sps:$4 sm:$0xff]  }
  0x4d   :  { %708 = vmatmul.mubr.msk.f32.gmra.mrb[2].mxu0 %vm97_vm0, %v68_v35  ;;  %400 = vmatpush1.bf16.msra.mxu1 %v815_v36  ;;  %v878_v13 = vld [vmem:[#allocation6 + $0x94] ss:$8 sps:$4 sm:$0xff]   ;;  %v876_v14 = vld [vmem:[#allocation6 + $0x90] ss:$8 sps:$4 sm:$0xff]   ;;  %v881_v15 = vld [vmem:[#allocation6 + $0xa4] ss:$8 sps:$4 sm:$0xff]  }
  0x4e   :  { %401 = vmatprep.subr.bf16.mxu1 %v816_v37  ;;  %v879_v16 = vld [vmem:[#allocation6 + $0xa0] ss:$8 sps:$4 sm:$0xff]   ;;  %v884_v17 = vld [vmem:[#allocation6 + $0xb4] ss:$8 sps:$4 sm:$0xff]   ;;  %v882_v18 = vld [vmem:[#allocation6 + $0xb0] ss:$8 sps:$4 sm:$0xff]  }
  0x4f   :  { %647 = vmatpush1.bf16.msra.mxu0 %v852_v62  ;;  %v887_v19 = vld [vmem:[#allocation6 + $0xc4] ss:$8 sps:$4 sm:$0xff]   ;;  %v885_v20 = vld [vmem:[#allocation6 + $0xc0] ss:$8 sps:$4 sm:$0xff]   ;;  %v890_v21 = vld [vmem:[#allocation6 + $0xd4] ss:$8 sps:$4 sm:$0xff]  }
  0x50   :  { %648 = vmatprep.subr.bf16.mxu0 %v857_v63  ;;  %v888_v22 = vld [vmem:[#allocation6 + $0xd0] ss:$8 sps:$4 sm:$0xff]   ;;  %v88_v24 = vshrl.u32 %v87_v23, 7  ;;  %v85_v26 = vld [vmem:[%s1080_s2] sm:$0x3] }
  0x51   :  { %402 = vmatpush1.bf16.msra.mxu1 %v818_v38 }
  0x52   :  { %403 = vmatprep.subr.bf16.mxu1 %v819_v39  ;;  %v89_v25 = vsub.s32 0, %v88_v24  ;;  %v93_v27 = vsub.s32 1, %v88_v24 }
  0x53   :  { %649 = vmatpush1.bf16.msra.mxu0 %v855_v0 }
  0x54   :  { %650 = vmatprep.subr.bf16.mxu0 %v860_v1  ;;  %v90_v28 = vrot.slane %v85_v26, %v89_v25  ;;  %v94_v30 = vrot.slane %v85_v26, %v93_v27  ;;  %v472_v1 = vld [vmem:[%s1084_s6] sm:$0x3] }
  0x55   :  { %404 = vmatpush1.bf16.msra.mxu1 %v821_v40 }
  0x56   :  { %405 = vmatprep.subr.bf16.mxu1 %v822_v41 }
  0x57   :  { %651 = vmatpush1.bf16.msra.mxu0 %v858_v2  ;;  %v477_v2 = vrot.slane %v472_v1, %v89_v25 }
  0x58   :  { %652 = vmatprep.subr.bf16.mxu0 %v863_v3  ;;  %v481_v3 = vrot.slane %v472_v1, %v93_v27 }
  0x59   :  { %406 = vmatpush1.bf16.msra.mxu1 %v824_v42 }
  0x5a   :  { %407 = vmatprep.subr.bf16.mxu1 %v825_v43 }
  0x5b   :  { %653 = vmatpush1.bf16.msra.mxu0 %v861_v4 }
  0x5c   :  { %654 = vmatprep.subr.bf16.mxu0 %v866_v5 }
  0x5d   :  { %408 = vmatpush1.bf16.msra.mxu1 %v827_v44  ;;  %v893_v44 = vld [vmem:[#allocation6 + $0xe4] ss:$8 sps:$4 sm:$0xff]  }
  0x5e   :  { %409 = vmatprep.subr.bf16.mxu1 %v828_v45  ;;  %v891_v45 = vld [vmem:[#allocation6 + $0xe0] ss:$8 sps:$4 sm:$0xff]  }
  0x5f   :  { %655 = vmatpush1.bf16.msra.mxu0 %v864_v6 }
  0x60   :  { %656 = vmatprep.subr.bf16.mxu0 %v869_v7 }
  0x61   :  { %410 = vmatpush1.bf16.msra.mxu1 %v830_v46  ;;  %v896_v46 = vld [vmem:[#allocation6 + $0xf4] ss:$8 sps:$4 sm:$0xff]  }
  0x62   :  { %411 = vmatprep.subr.bf16.mxu1 %v831_v47  ;;  %v894_v47 = vld [vmem:[#allocation6 + $0xf0] ss:$8 sps:$4 sm:$0xff]  }
  0x63   :  { %657 = vmatpush1.bf16.msra.mxu0 %v867_v8 }
  0x64   :  { %658 = vmatprep.subr.bf16.mxu0 %v872_v9 }
  0x65   :  { %412 = vmatpush1.bf16.msra.mxu1 %v833_v48  ;;  %v219_v48 = vld [vmem:[%s1082_s4] sm:$0x3] }
  0x66   :  { %413 = vmatprep.subr.bf16.mxu1 %v834_v49  ;;  %v224_v49 = vrot.slane %v219_v48, %v89_v25 }
  0x67   :  { %659 = vmatpush1.bf16.msra.mxu0 %v870_v10 }
  0x68   :  { %660 = vmatprep.subr.bf16.mxu0 %v875_v11 }
  0x69   :  { %414 = vmatpush1.bf16.msra.mxu1 %v836_v50  ;;  %v228_v50 = vrot.slane %v219_v48, %v93_v27 }
  0x6a   :  { %415 = vmatprep.subr.bf16.mxu1 %v837_v51 }
  0x6b   :  { %661 = vmatpush1.bf16.msra.mxu0 %v873_v12 }
  0x6c   :  { %662 = vmatprep.subr.bf16.mxu0 %v878_v13 }
  0x6d   :  { %416 = vmatpush1.bf16.msra.mxu1 %v839_v52 }
  0x6e   :  { %417 = vmatprep.subr.bf16.mxu1 %v840_v53 }
  0x6f   :  { %663 = vmatpush1.bf16.msra.mxu0 %v876_v14 }
  0x70   :  { %664 = vmatprep.subr.bf16.mxu0 %v881_v15 }
  0x71   :  { %418 = vmatpush1.bf16.msra.mxu1 %v842_v54 }
  0x72   :  { %419 = vmatprep.subr.bf16.mxu1 %v843_v55 }
  0x73   :  { %665 = vmatpush1.bf16.msra.mxu0 %v879_v16 }
  0x74   :  { %666 = vmatprep.subr.bf16.mxu0 %v884_v17 }
  0x75   :  { %420 = vmatpush1.bf16.msra.mxu1 %v845_v56 }
  0x76   :  { %421 = vmatprep.subr.bf16.mxu1 %v846_v57 }
  0x77   :  { %667 = vmatpush1.bf16.msra.mxu0 %v882_v18 }
  0x78   :  { %668 = vmatprep.subr.bf16.mxu0 %v887_v19 }
  0x79   :  { %422 = vmatpush1.bf16.msra.mxu1 %v848_v58 }
  0x7b   :  { %669 = vmatpush1.bf16.msra.mxu0 %v885_v20 }
  0x7c   :  { %670 = vmatprep.subr.bf16.mxu0 %v890_v21 }
  0x7f   :  { %671 = vmatpush1.bf16.msra.mxu0 %v888_v22 }
  0x80   :  { %672 = vmatprep.subr.bf16.mxu0 %v893_v44 }
  0x83   :  { %673 = vmatpush1.bf16.msra.mxu0 %v891_v45 }
  0x84   :  { %674 = vmatprep.subr.bf16.mxu0 %v896_v46 }
  0x87   :  { %675 = vmatpush1.bf16.msra.mxu0 %v894_v47 }
 0x11c   :  { %v170_v29 = vpop.f32.mrb[0].mxu0 }
 0x11d   :  { %v172_v31 = vpop.f32.mrb[1].mxu0  ;;  %v171_v32 = vadd.f32 %v170_v29, %v90_v28 }
 0x11e   :  { %v173_v33 = vadd.f32 %v172_v31, %v94_v30 }
 0x11f   :  { %v181_v38 = vmax.f32 %v171_v32, 0.0 }
 0x120   :  { %v176_v34 = vpop.f32.mrb[2].mxu0  ;;  %v182_v40 = vmax.f32 %v173_v33, 0.0 }
 0x121   :  { %v177_v35 = vadd.f32 %v176_v34, %v90_v28  ;;  %v178_v36 = vpop.f32.mrb[3].mxu0 }
 0x122   :  { %v179_v37 = vadd.f32 %v178_v36, %v94_v30 }
 0x123   :  { %v183_v39 = vmax.f32 %v177_v35, 0.0 }
 0x124   :  { %v184_v41 = vmax.f32 %v179_v37, 0.0 }
 0x125   :  { %v185_v42 = vpack.c.bf16 %v183_v39, %v181_v38 }
 0x126   :  { %v186_v43 = vpack.c.bf16 %v184_v41, %v182_v40 }
 0x128   :  { %423 = vmatprep.mubr.bf16.mxu1 %v186_v43 }
 0x129   :  { %424 = vmatmul.mubr.bf16.vlgmr.msra.gmra.mrb[0].mxu1 %v185_v42 }
 0x1fc   :  { %v425_v51 = vpop.f32.mrb[0].mxu1 }
 0x1fd   :  { %v426_v52 = vadd.f32 %v425_v51, %v224_v49  ;;  %v427_v53 = vpop.f32.mrb[1].mxu1 }
 0x1fe   :  { %v428_v54 = vadd.f32 %v427_v53, %v228_v50  ;;  %v429_v55 = vpop.f32.mrb[2].mxu1 }
 0x1ff   :  { %v430_v56 = vadd.f32 %v429_v55, %v224_v49  ;;  %v431_v57 = vpop.f32.mrb[3].mxu1  ;;  %v434_v59 = vmax.f32 %v426_v52, 0.0 }
 0x200   :  { %v432_v58 = vadd.f32 %v431_v57, %v228_v50  ;;  %v435_v61 = vmax.f32 %v428_v54, 0.0 }
 0x201   :  { %v436_v60 = vmax.f32 %v430_v56, 0.0 }
 0x202   :  { %v437_v62 = vmax.f32 %v432_v58, 0.0 }
 0x203   :  { %v438_v63 = vpack.c.bf16 %v436_v60, %v434_v59 }
 0x204   :  { %v439_v0 = vpack.c.bf16 %v437_v62, %v435_v61 }
 0x206   :  { %676 = vmatprep.mubr.bf16.mxu0 %v439_v0 }
 0x207   :  { %677 = vmatmul.mubr.bf16.vlgmr.msra.gmra.mrb[4].mxu0 %v438_v63 }
 0x2da   :  { %v678_v4 = vpop.f32.mrb[4].mxu0 }
 0x2db   :  { %v679_v5 = vadd.f32 %v678_v4, %v477_v2  ;;  %v680_v6 = vpop.f32.mrb[5].mxu0 }
 0x2dc   :  { %v681_v7 = vadd.f32 %v680_v6, %v481_v3  ;;  %v682_v8 = vpop.f32.mrb[6].mxu0 }
 0x2dd   :  { %v683_v9 = vadd.f32 %v682_v8, %v477_v2  ;;  %v684_v10 = vpop.f32.mrb[7].mxu0 }
 0x2de   :  { %v775_v11 = vpack.c.bf16 %v681_v7, %v679_v5  ;;  %v685_v12 = vadd.f32 %v684_v10, %v481_v3 }
 0x2e0   :  { %699 = vst [vmem:[%s1085_s7] sm:$0xff] %v775_v11  ;;  %v776_v13 = vpack.c.bf16 %v685_v12, %v683_v9 }
 0x2e2   :  { %700 = vst [vmem:[%s1085_s7 + $0x8] sm:$0xff] %v776_v13 }
 0x2e3   :  { %705 = vsyncpa [#allocation3], 1 }
 0x2e4   :  { %706 = vsyncpa [#allocation5], 1 }

</bundles_post_ra>
